<compile_context>
chip_gen: v5e
topology: v5e:2x2
jax: 0.10.0
libtpu: 0.0.40
codegen_flags: <defaults>
</compile_context>

<pallas_src>
import jax
import jax.numpy as jnp
from jax.experimental import pallas as pl
from jax.experimental.pallas import tpu as pltpu

HIDDEN = 100
HIDDEN_PAD = 128   # lane-dense hidden width
LANE = 128         # lane-dense output width


def _round_up(x, m):
    return (x + m - 1) // m * m


def critic_kernel(s_ref, a_ref, w1s_ref, w1a_ref, b1_ref, w2_ref, b2_ref, o_ref):
    # s_ref : [TB, n_states]          a_ref : [TB, n_actions]
    # w1s   : [n_states, 128]         w1a   : [n_actions, 128]       b1: [1, 128]
    # w2    : [128, 128]              b2    : [1, 128]
    # o_ref : [TB, 128]   (zero-padded columns beyond n_actions)
    h = (
        jnp.dot(s_ref[...], w1s_ref[...], preferred_element_type=jnp.float32)
        + jnp.dot(a_ref[...], w1a_ref[...], preferred_element_type=jnp.float32)
        + b1_ref[...]
    )
    h = jnp.maximum(h, 0.0)  # ReLU (lane-dense 128-wide)
    v = jnp.dot(h.astype(w2_ref.dtype), w2_ref[...],
                preferred_element_type=jnp.float32) + b2_ref[...]
    o_ref[...] = v.astype(o_ref.dtype)


def critic_forward(s, a, packed_params, *, block_b=512):
    """s: [B, n_states], a: [B, n_actions] -> state_value: [B, n_actions]."""
    w1s, w1a, b1, w2, b2 = packed_params
    B, n_states = s.shape
    n_actions = a.shape[1]
    out_pad = w2.shape[1]  # 128

    # Batch tile: multiple of 8 (sublane rule), up to block_b rows for pipelining.
    TB = min(block_b, _round_up(B, 8))
    Bp = _round_up(B, TB)
    if Bp != B:
        s = jnp.pad(s, ((0, Bp - B), (0, 0)))
        a = jnp.pad(a, ((0, Bp - B), (0, 0)))

    grid = (Bp // TB,)

    out = pl.pallas_call(
        critic_kernel,
        out_shape=jax.ShapeDtypeStruct((Bp, out_pad), jnp.float32),
        grid_spec=pltpu.PrefetchScalarGridSpec(
            num_scalar_prefetch=0,
            grid=grid,
            in_specs=[
                # activations: tiled over batch, double-buffered by the pipeline
                pl.BlockSpec((TB, n_states), lambda i: (i, 0)),
                pl.BlockSpec((TB, n_actions), lambda i: (i, 0)),
                # weights / biases: constant block index -> stay resident in VMEM
                pl.BlockSpec(w1s.shape, lambda i: (0, 0)),
                pl.BlockSpec(w1a.shape, lambda i: (0, 0)),
                pl.BlockSpec(b1.shape, lambda i: (0, 0)),
                pl.BlockSpec(w2.shape, lambda i: (0, 0)),
                pl.BlockSpec(b2.shape, lambda i: (0, 0)),
            ],
            out_specs=pl.BlockSpec((TB, out_pad), lambda i: (i, 0)),
        ),
        compiler_params=pltpu.CompilerParams(
            dimension_semantics=("parallel",),  # shard batch tiles across TCs (v7x)
        ),
    )(s, a, w1s, w1a, b1, w2, b2)

    # Slice away the batch padding and the zero-padded output lanes.
    return out[:B, :n_actions]


def init_params(key, n_actions, n_states, hidden=HIDDEN):
    """Logical (unpadded) params mimicking nn.Linear default init; [in, out] layout."""
    d_in = n_actions + n_states
    k1, k2, k3, k4 = jax.random.split(key, 4)
    bound1 = 1.0 / jnp.sqrt(d_in)
    bound2 = 1.0 / jnp.sqrt(hidden)
    w1 = jax.random.uniform(k1, (d_in, hidden), jnp.float32, -bound1, bound1)
    b1 = jax.random.uniform(k2, (hidden,), jnp.float32, -bound1, bound1)
    w2 = jax.random.uniform(k3, (hidden, n_actions), jnp.float32, -bound2, bound2)
    b2 = jax.random.uniform(k4, (n_actions,), jnp.float32, -bound2, bound2)
    return w1, b1, w2, b2


def pack_params(params, n_states, n_actions, hidden=HIDDEN):
    """Split w1 by input (s vs a), zero-pad hidden->128 and output->128 (exact)."""
    w1, b1, w2, b2 = params
    hp = HIDDEN_PAD - hidden
    op = LANE - n_actions

    w1s = jnp.pad(w1[:n_states, :], ((0, 0), (0, hp)))          # [n_states, 128]
    w1a = jnp.pad(w1[n_states:, :], ((0, 0), (0, hp)))          # [n_actions, 128]
    b1p = jnp.pad(b1, (0, hp)).reshape(1, HIDDEN_PAD)            # [1, 128]
    w2p = jnp.pad(w2, ((0, hp), (0, op)))                        # [128, 128]
    b2p = jnp.pad(b2, (0, op)).reshape(1, LANE)                  # [1, 128]
    return w1s, w1a, b1p, w2p, b2p


if __name__ == "__main__":
    n_states = 16
    n_actions = 4
    batch = 8

    key = jax.random.PRNGKey(0)
    kp, ks, ka = jax.random.split(key, 3)

    params = init_params(kp, n_actions, n_states)
    packed = pack_params(params, n_states, n_actions)

    s = jax.random.normal(ks, (batch, n_states), jnp.float32)
    a = jax.random.normal(ka, (batch, n_actions), jnp.float32)

    out = critic_forward(s, a, packed)
    jax.block_until_ready(out)

    # Reference check (pure JAX, unpadded weights).
    w1, b1, w2, b2 = params
    x = jnp.concatenate([s, a], axis=1)
    ref = jnp.maximum(x @ w1 + b1, 0.0) @ w2 + b2
    assert out.shape == (batch, n_actions)
    assert jnp.allclose(out, ref, atol=1e-4, rtol=1e-4)

    print("KERNEL_OK")
</pallas_src>

<mosaic_0001>
module attributes {stable_mosaic.version = 11 : i64} {
  func.func @critic_kernel(%arg0: i32, %arg1: memref<8x16xf32, #tpu.memory_space<vmem>>, %arg2: memref<8x4xf32, #tpu.memory_space<vmem>>, %arg3: memref<16x128xf32, #tpu.memory_space<vmem>>, %arg4: memref<4x128xf32, #tpu.memory_space<vmem>>, %arg5: memref<1x128xf32, #tpu.memory_space<vmem>>, %arg6: memref<128x128xf32, #tpu.memory_space<vmem>>, %arg7: memref<1x128xf32, #tpu.memory_space<vmem>>, %arg8: memref<8x128xf32, #tpu.memory_space<vmem>>) attributes {dimension_semantics = [#tpu.dimension_semantics<parallel>], iteration_bounds = array<i64: 1>, scalar_prefetch = 0 : i64, scratch_operands = 0 : i64, tpu.core_type = #tpu.core_type<tc>, window_params = [{transform_indices = @transform_0, window_bounds = array<i64: 8, 16>}, {transform_indices = @transform_1, window_bounds = array<i64: 8, 4>}, {pipeline_mode = #tpu.pipeline_mode<synchronous>, transform_indices = @transform_2, window_bounds = array<i64: 16, 128>}, {pipeline_mode = #tpu.pipeline_mode<synchronous>, transform_indices = @transform_3, window_bounds = array<i64: 4, 128>}, {pipeline_mode = #tpu.pipeline_mode<synchronous>, transform_indices = @transform_4, window_bounds = array<i64: 1, 128>}, {pipeline_mode = #tpu.pipeline_mode<synchronous>, transform_indices = @transform_5, window_bounds = array<i64: 128, 128>}, {pipeline_mode = #tpu.pipeline_mode<synchronous>, transform_indices = @transform_6, window_bounds = array<i64: 1, 128>}, {transform_indices = @transform_7, window_bounds = array<i64: 8, 128>}]} {
    %c0 = arith.constant 0 : index
    %c0_0 = arith.constant 0 : index
    %0 = vector.load %arg1[%c0, %c0_0] : memref<8x16xf32, #tpu.memory_space<vmem>>, vector<8x16xf32>
    %c0_1 = arith.constant 0 : index
    %c0_2 = arith.constant 0 : index
    %1 = vector.load %arg3[%c0_1, %c0_2] : memref<16x128xf32, #tpu.memory_space<vmem>>, vector<16x128xf32>
    %cst = arith.constant dense<0.000000e+00> : vector<8x128xf32>
    %2 = tpu.matmul %0, %1, %cst {dimension_numbers = #tpu.dot_dimension_numbers<[1], [0], [0], [1], [0, 0, 1, 1], [], []>} : vector<8x16xf32>, vector<16x128xf32>, vector<8x128xf32> -> vector<8x128xf32>
    %c0_3 = arith.constant 0 : index
    %c0_4 = arith.constant 0 : index
    %3 = vector.load %arg2[%c0_3, %c0_4] : memref<8x4xf32, #tpu.memory_space<vmem>>, vector<8x4xf32>
    %c0_5 = arith.constant 0 : index
    %c0_6 = arith.constant 0 : index
    %4 = vector.load %arg4[%c0_5, %c0_6] : memref<4x128xf32, #tpu.memory_space<vmem>>, vector<4x128xf32>
    %cst_7 = arith.constant dense<0.000000e+00> : vector<8x128xf32>
    %5 = tpu.matmul %3, %4, %cst_7 {dimension_numbers = #tpu.dot_dimension_numbers<[1], [0], [0], [1], [0, 0, 1, 1], [], []>} : vector<8x4xf32>, vector<4x128xf32>, vector<8x128xf32> -> vector<8x128xf32>
    %6 = arith.addf %2, %5 : vector<8x128xf32>
    %c0_8 = arith.constant 0 : index
    %c0_9 = arith.constant 0 : index
    %7 = vector.load %arg5[%c0_8, %c0_9] : memref<1x128xf32, #tpu.memory_space<vmem>>, vector<1x128xf32>
    %8 = vector.broadcast %7 : vector<1x128xf32> to vector<8x128xf32>
    %9 = arith.addf %6, %8 : vector<8x128xf32>
    %cst_10 = arith.constant 0.000000e+00 : f32
    %10 = vector.broadcast %cst_10 : f32 to vector<8x128xf32>
    %11 = arith.maximumf %9, %10 : vector<8x128xf32>
    %c0_11 = arith.constant 0 : index
    %c0_12 = arith.constant 0 : index
    %12 = vector.load %arg6[%c0_11, %c0_12] : memref<128x128xf32, #tpu.memory_space<vmem>>, vector<128x128xf32>
    %cst_13 = arith.constant dense<0.000000e+00> : vector<8x128xf32>
    %13 = tpu.matmul %11, %12, %cst_13 {dimension_numbers = #tpu.dot_dimension_numbers<[1], [0], [0], [1], [0, 0, 1, 1], [], []>} : vector<8x128xf32>, vector<128x128xf32>, vector<8x128xf32> -> vector<8x128xf32>
    %c0_14 = arith.constant 0 : index
    %c0_15 = arith.constant 0 : index
    %14 = vector.load %arg7[%c0_14, %c0_15] : memref<1x128xf32, #tpu.memory_space<vmem>>, vector<1x128xf32>
    %15 = vector.broadcast %14 : vector<1x128xf32> to vector<8x128xf32>
    %16 = arith.addf %13, %15 : vector<8x128xf32>
    %c0_16 = arith.constant 0 : index
    %c0_17 = arith.constant 0 : index
    %17 = vector.load %arg8[%c0_16, %c0_17] : memref<8x128xf32, #tpu.memory_space<vmem>>, vector<8x128xf32>
    tpu.vector_store %arg8[%c0_16, %c0_17], %16 {strides = array<i32>} : memref<8x128xf32, #tpu.memory_space<vmem>>, vector<8x128xf32>,
    return
  }
  func.func @transform_0(%arg0: i32) -> (i32, i32) {
    %c0_i32 = arith.constant 0 : i32
    %c0_i32_0 = arith.constant 0 : i32
    return %arg0, %c0_i32 : i32, i32
  }
  func.func @transform_1(%arg0: i32) -> (i32, i32) {
    %c0_i32 = arith.constant 0 : i32
    %c0_i32_0 = arith.constant 0 : i32
    return %arg0, %c0_i32 : i32, i32
  }
  func.func @transform_2(%arg0: i32) -> (i32, i32) {
    %c0_i32 = arith.constant 0 : i32
    %c0_i32_0 = arith.constant 0 : i32
    %c0_i32_1 = arith.constant 0 : i32
    return %c0_i32, %c0_i32_0 : i32, i32
  }
  func.func @transform_3(%arg0: i32) -> (i32, i32) {
    %c0_i32 = arith.constant 0 : i32
    %c0_i32_0 = arith.constant 0 : i32
    %c0_i32_1 = arith.constant 0 : i32
    return %c0_i32, %c0_i32_0 : i32, i32
  }
  func.func @transform_4(%arg0: i32) -> (i32, i32) {
    %c0_i32 = arith.constant 0 : i32
    %c0_i32_0 = arith.constant 0 : i32
    %c0_i32_1 = arith.constant 0 : i32
    return %c0_i32, %c0_i32_0 : i32, i32
  }
  func.func @transform_5(%arg0: i32) -> (i32, i32) {
    %c0_i32 = arith.constant 0 : i32
    %c0_i32_0 = arith.constant 0 : i32
    %c0_i32_1 = arith.constant 0 : i32
    return %c0_i32, %c0_i32_0 : i32, i32
  }
  func.func @transform_6(%arg0: i32) -> (i32, i32) {
    %c0_i32 = arith.constant 0 : i32
    %c0_i32_0 = arith.constant 0 : i32
    %c0_i32_1 = arith.constant 0 : i32
    return %c0_i32, %c0_i32_0 : i32, i32
  }
  func.func @transform_7(%arg0: i32) -> (i32, i32) {
    %c0_i32 = arith.constant 0 : i32
    %c0_i32_0 = arith.constant 0 : i32
    return %arg0, %c0_i32 : i32, i32
  }
}

</mosaic_0001>

<bundles_post_ra>
// kernel: tpu_custom_call.1
= control target key start
LH: loop header
LB: loop body
LE: loop exit
PB: predicated region body
PF: predicated region fallthrough
CT: control target
= control target key end

     0   :  { %12 = vsyncpa [#allocation3], 0  ;;  %s338_s0 = inlined_call_operand.vmem [shape: f32[8,16], index: 0, kind: input, shape index: {}]   ;;  %s339_s1 = inlined_call_operand.vmem [shape: f32[8,4], index: 1, kind: input, shape index: {}]   ;;  %s340_s2 = inlined_call_operand.hbm [shape: f32[16,128], index: 2, kind: input, shape index: {}]   ;;  %s341_s3 = inlined_call_operand.vmem [shape: f32[4,128], index: 3, kind: input, shape index: {}]   ;;  %s342_s4 = inlined_call_operand.vmem [shape: f32[1,128], index: 4, kind: input, shape index: {}]   ;;  %s343_s5 = inlined_call_operand.hbm [shape: f32[128,128], index: 5, kind: input, shape index: {}]   ;;  %s344_s6 = inlined_call_operand.vmem [shape: f32[1,128], index: 6, kind: input, shape index: {}]   ;;  %s345_s7 = inlined_call_operand.hbm [shape: f32[8,128], index: 7, kind: output, shape index: {}]  }
   0x1   :  { %13 = vsyncpa [#allocation6], 0 }
   0x2   :  { %14 = vsyncpa [#allocation4], 0  ;;  %s23_s26 = sshll.u32 %s340_s2, 4  ;;  %s269_s27 = smov [#allocation2]   ;;  %s24_s26 = int_to_ptr.hbm [resolvable:$true] %s23_s26 }
   0x3   :  { %s25_s28 = sshll.u32 %s269_s27, 4  ;;  %s40_s8 = sshll.u32 %s343_s5, 4  ;;  %s26_s28 = int_to_ptr.vmem [resolvable:$true] %s25_s28  ;;  %s41_s8 = int_to_ptr.hbm [resolvable:$true] %s40_s8 }
   0x4   :  { %s270_s9 = smov 128   ;;  %s271_s10 = smov 8  }
   0x5   :  { %31 = dma.hbm_to_vmem [thread:$0]  %s24_s26, 256, %s26_s28, [#allocation3], %s270_s9, %s270_s9, %s271_s10  }
   0x6   :  { %s272_s11 = smov [#allocation5]  }
   0x7   :  { %s42_s12 = sshll.u32 %s272_s11, 4  ;;  %s43_s12 = int_to_ptr.vmem [resolvable:$true] %s42_s12 }
   0x8   :  { %48 = dma.hbm_to_vmem [thread:$0]  %s41_s8, 2048, %s43_s12, [#allocation6], %s270_s9, %s270_s9, %s271_s10  }
   0x9   :  { %263 = dma.done.wait [#allocation3], 256  }
   0xa   :  { %264 = vsyncadd [#allocation3], 4294967040 }
   0xb   :  { %265 = dma.done.wait [#allocation6], 2048  }
   0xc   :  { %266 = vsyncadd [#allocation6], 4294965248  ;;  %vm68_vm0 = vcmask 1043456   ;;  %vm64_vm1 = vcmask 31744   ;;  %v61_v0 = vld [vmem:[#allocation2 + $0x8] sm:$0xff]  ;;  %v60_v2 = vld [vmem:[#allocation2] sm:$0xff] }
   0xd   :  { %v63_v1 = vld [vmem:[%s341_s3] sm:$0xf]  ;;  %110 = vmatpush.msra.mxu1 %v61_v0  ;;  %vm92_vm2 = vcmask 130048   ;;  %v137_v5 = vld [vmem:[#allocation5 + $0x78] sm:$0xff]  ;;  %v135_v7 = vld [vmem:[#allocation5 + $0x68] sm:$0xff]  ;;  %s273_s18 = smov [#allocation7]  }
   0xe   :  { %181 = vmatpush.msk.msra.mxu0 %vm68_vm0, %v63_v1  ;;  %v62_v3 = vld [vmem:[%s339_s1] sm:$0xff]  ;;  %142 = vmatpush.msra.mxu2 %v137_v5  ;;  %v134_v8 = vld [vmem:[#allocation5 + $0x60] sm:$0xff]  ;;  %v133_v9 = vld [vmem:[#allocation5 + $0x58] sm:$0xff]  ;;  %s168_s19 = sshll.u32 %s273_s18, 4  ;;  %s170_s22 = sshll.u32 %s345_s7, 4  ;;  %s169_s19 = int_to_ptr.vmem [resolvable:$true] %s168_s19  ;;  %s171_s22 = int_to_ptr.hbm [resolvable:$true] %s170_s22 }
   0xf   :  { %v59_v4 = vld [vmem:[%s338_s0] sm:$0xff]  ;;  %182 = vmatmul.msk.f32.vlgmr.msra.gmra.mxu0 %vm64_vm1, %v62_v3  ;;  %111 = vmatpush.msra.mxu1 %v60_v2  ;;  %v131_v11 = vld [vmem:[#allocation5 + $0x48] sm:$0xff]  ;;  %v130_v12 = vld [vmem:[#allocation5 + $0x40] sm:$0xff] }
  0x10   :  { %v136_v6 = vld [vmem:[#allocation5 + $0x70] sm:$0xff]  ;;  %183 = vmatmul.msk.f32.vlgmr.msra.gmra.mxu1 %vm92_vm2, %v59_v4  ;;  %v129_v13 = vld [vmem:[#allocation5 + $0x38] sm:$0xff]  ;;  %v127_v15 = vld [vmem:[#allocation5 + $0x28] sm:$0xff] }
  0x11   :  { %143 = vmatpush.msra.mxu2 %v136_v6  ;;  %v132_v10 = vld [vmem:[#allocation5 + $0x50] sm:$0xff]  ;;  %v126_v16 = vld [vmem:[#allocation5 + $0x20] sm:$0xff]  ;;  %v125_v17 = vld [vmem:[#allocation5 + $0x18] sm:$0xff] }
  0x12   :  { %v128_v14 = vld [vmem:[#allocation5 + $0x30] sm:$0xff]  ;;  %v123_v19 = vld [vmem:[#allocation5 + $0x8] sm:$0xff]  ;;  %v122_v20 = vld [vmem:[#allocation5] sm:$0xff] }
  0x13   :  { %144 = vmatpush.msra.mxu2 %v135_v7  ;;  %v124_v18 = vld [vmem:[#allocation5 + $0x10] sm:$0xff] }
  0x14   :  { %v189_v22 = vld [vmem:[%s342_s4] ss:$0 sm:$0xff] }
  0x15   :  { %145 = vmatpush.msra.mxu2 %v134_v8  ;;  %v190_v27 = vld [vmem:[%s344_s6] ss:$0 sm:$0xff] }
  0x17   :  { %146 = vmatpush.msra.mxu2 %v133_v9 }
  0x19   :  { %147 = vmatpush.msra.mxu2 %v132_v10 }
  0x1b   :  { %148 = vmatpush.msra.mxu2 %v131_v11 }
  0x1d   :  { %149 = vmatpush.msra.mxu2 %v130_v12 }
  0x1f   :  { %150 = vmatpush.msra.mxu2 %v129_v13 }
  0x21   :  { %151 = vmatpush.msra.mxu2 %v128_v14 }
  0x23   :  { %152 = vmatpush.msra.mxu2 %v127_v15 }
  0x25   :  { %153 = vmatpush.msra.mxu2 %v126_v16 }
  0x27   :  { %154 = vmatpush.msra.mxu2 %v125_v17 }
  0x29   :  { %155 = vmatpush.msra.mxu2 %v124_v18 }
  0x2b   :  { %156 = vmatpush.msra.mxu2 %v123_v19 }
  0x2d   :  { %157 = vmatpush.msra.mxu2 %v122_v20 }
  0x8c   :  { %v89_v21 = vpop.f32.mrf.mxu0 }
  0x8d   :  { %v113_v23 = vpop.f32.mrf.mxu1 }
  0x8e   :  { %v114_v24 = vadd.f32 %v113_v23, %v89_v21 }
  0x90   :  { %v120_v25 = vadd.f32 %v189_v22, %v114_v24 }
  0x92   :  { %v121_v26 = vmax.f32 %v120_v25, 0.0 }
  0x94   :  { %158 = vmatmul.f32.vlgmr.msra.gmra.mxu2 %v121_v26 }
 0x117   :  { %v159_v28 = vpop.f32.mrf.mxu2 }
 0x118   :  { %v160_v29 = vadd.f32 %v190_v27, %v159_v28 }
 0x11a   :  { %162 = vst [vmem:[#allocation7] sm:$0xff] %v160_v29 }
 0x11b   :  { %173 = dma.vmem_to_hbm [thread:$0]  %s169_s19, 128, %s171_s22, [#allocation4]  }
 0x11c   :  { %267 = dma.done.wait [#allocation4], 128  }
 0x11d   :  { %268 = vsyncadd [#allocation4], 4294967168 }
 0x11e   :  { %178 = vsyncpa [#allocation3], 1 }
 0x11f   :  { %179 = vsyncpa [#allocation6], 1 }
 0x120   :  { %180 = vsyncpa [#allocation4], 1 }

</bundles_post_ra>
